<compile_context>
chip_gen: v7x
topology: tpu7x:2x2x1
jax: 0.10.0
libtpu: 0.0.40
codegen_flags: <defaults>
</compile_context>

<pallas_src>
import functools

import jax
import jax.numpy as jnp
from jax.experimental import pallas as pl
from jax.experimental.pallas import tpu as pltpu


def _ff_kernel(x_ref, w1_ref, b1_ref, w2_ref, p_ref, o_ref,
               *, eps: float, pre_lnorm: bool):
    x = x_ref[...]                                   # (tm, d_model), native dtype
    x32 = x.astype(jnp.float32)

    # Hoisted parameter loads / casts (once per grid step).
    params = p_ref[...].astype(jnp.float32)          # (3, d_model): b2, gamma, beta
    b2 = params[0:1, :]
    gamma = params[1:2, :]
    beta = params[2:3, :]
    b1 = b1_ref[...].astype(jnp.float32)             # (1, d_inner)

    def layer_norm(y):                               # y: f32, one-pass statistics
        mean = jnp.mean(y, axis=-1, keepdims=True)
        mean_sq = jnp.mean(y * y, axis=-1, keepdims=True)
        var = jnp.maximum(mean_sq - mean * mean, 0.0)
        return (y - mean) * jax.lax.rsqrt(var + eps) * gamma + beta

    core_in = layer_norm(x32) if pre_lnorm else x32
    # Matched MXU operand dtypes (bf16 weights -> full-rate MXU, f32 accumulate).
    core_in = core_in.astype(w1_ref.dtype)

    # Linear 1 + ReLU
    h = jnp.dot(core_in, w1_ref[...], preferred_element_type=jnp.float32)
    h = jnp.maximum(h + b1, 0.0)
    # Linear 2
    h = h.astype(w2_ref.dtype)
    core = jnp.dot(h, w2_ref[...], preferred_element_type=jnp.float32) + b2

    out = core + x32 if pre_lnorm else layer_norm(x32 + core)
    o_ref[...] = out.astype(o_ref.dtype)


def _round_up(x, m):
    return (x + m - 1) // m * m


def _cdiv(a, b):
    return (a + b - 1) // b


def _const_spec(shape):
    """BlockSpec for a grid-invariant operand; single-buffered when supported."""
    index_map = lambda i: (0,) * len(shape)
    if hasattr(pl, "Buffered"):
        try:
            return pl.BlockSpec(shape, index_map, pipeline_mode=pl.Buffered(1))
        except TypeError:
            pass
    return pl.BlockSpec(shape, index_map)


def positionwise_ff(inp, w1, b1, w2, b2, gamma, beta,
                    *, eps=1e-5, pre_lnorm=False, row_tile=None):
    """inp: (seq_len, batch, d_model). Returns same shape/dtype."""
    seq_len, batch, d_model = inp.shape
    d_inner = w1.shape[1]
    n_rows = seq_len * batch
    itemsize = jnp.dtype(inp.dtype).itemsize

    # Per-generation VMEM cap with headroom for Mosaic scratch / semaphores.
    try:
        vmem_cap = int(pltpu.get_tpu_info().vmem_capacity_bytes)
    except Exception:  # pragma: no cover - conservative fallback
        vmem_cap = 64 * 1024 * 1024
    vmem_limit = max(32 << 20, min(vmem_cap - (16 << 20), 110 << 20))

    w_bytes = (w1.size * jnp.dtype(w1.dtype).itemsize
               + w2.size * jnp.dtype(w2.dtype).itemsize
               + (b1.size + b2.size + gamma.size + beta.size) * 4)

    # Sublane-aligned row tile (bf16 needs multiples of 16, f32 of 8).
    sub = 16 if inp.dtype == jnp.bfloat16 else 8
    n_sub = _round_up(n_rows, sub)

    if row_tile is not None:
        tile = _round_up(min(int(row_tile), n_sub), sub)
    else:
        # How many rows fit next to the (single-buffered) resident weights.
        per_row = (2 * 2 * d_model * itemsize      # x + out tiles, double-buffered
                   + 2 * 4 * d_inner               # f32 hidden + narrow cast copy
                   + 6 * 4 * d_model)              # f32 epilogue temporaries
        budget = vmem_limit - w_bytes - (6 << 20)
        cap = max(sub, budget // per_row) if budget > 0 else sub
        tile = min(512, cap, n_sub)
        for align in (256, 128):                   # MXU-friendly M (2x256 / 4x128)
            if tile >= align:
                tile = (tile // align) * align
                break
        tile = max(sub, (tile // sub) * sub)
        # Keep >=2 grid steps when rows allow (shards across v7x's 2 TensorCores).
        if _round_up(n_rows, tile) // tile == 1:
            half = _round_up(_cdiv(n_rows, 2), sub)
            if half < tile:
                tile = half

    n_pad = _round_up(n_rows, tile)
    x2d = inp.reshape(n_rows, d_model)
    if n_pad != n_rows:
        x2d = jnp.pad(x2d, ((0, n_pad - n_rows), (0, 0)))

    b1_2d = b1.reshape(1, d_inner)
    # b2 / gamma / beta collapsed into one (3, d_model) operand -> one DMA.
    pvec = jnp.stack([b2.astype(jnp.float32),
                      gamma.astype(jnp.float32),
                      beta.astype(jnp.float32)], axis=0)

    kernel = functools.partial(_ff_kernel, eps=float(eps), pre_lnorm=bool(pre_lnorm))

    cost = pl.CostEstimate(
        flops=4 * n_pad * d_model * d_inner,                 # two matmuls
        transcendentals=n_pad,                               # rsqrt per row
        bytes_accessed=2 * n_pad * d_model * itemsize + w_bytes,
    )

    grid = (n_pad // tile,)
    out2d = pl.pallas_call(
        kernel,
        out_shape=jax.ShapeDtypeStruct((n_pad, d_model), inp.dtype),
        grid_spec=pltpu.PrefetchScalarGridSpec(
            num_scalar_prefetch=0,
            grid=grid,
            in_specs=[
                pl.BlockSpec((tile, d_model), lambda i: (i, 0)),  # x rows
                _const_spec((d_model, d_inner)),                  # W1 (resident)
                _const_spec((1, d_inner)),                        # b1
                _const_spec((d_inner, d_model)),                  # W2 (resident)
                _const_spec((3, d_model)),                        # b2/gamma/beta
            ],
            out_specs=pl.BlockSpec((tile, d_model), lambda i: (i, 0)),
        ),
        compiler_params=pltpu.CompilerParams(
            dimension_semantics=("parallel",),    # megacore-shard the row grid
            vmem_limit_bytes=vmem_limit,
        ),
        cost_estimate=cost,
    )(x2d, w1, b1_2d, w2, pvec)

    if n_pad != n_rows:
        out2d = out2d[:n_rows]
    return out2d.reshape(seq_len, batch, d_model)


def _reference(inp, w1, b1, w2, b2, gamma, beta, *, eps=1e-5, pre_lnorm=False):
    """Plain-JAX (f32) reference mirroring the PyTorch forward (eval mode)."""
    inp = inp.astype(jnp.float32)
    w1, b1 = w1.astype(jnp.float32), b1.astype(jnp.float32)
    w2, b2 = w2.astype(jnp.float32), b2.astype(jnp.float32)
    gamma, beta = gamma.astype(jnp.float32), beta.astype(jnp.float32)

    def ln(y):
        mean = jnp.mean(y, axis=-1, keepdims=True)
        var = jnp.mean((y - mean) ** 2, axis=-1, keepdims=True)
        return (y - mean) / jnp.sqrt(var + eps) * gamma + beta

    core_in = ln(inp) if pre_lnorm else inp
    h = jnp.maximum(core_in @ w1 + b1, 0.0)
    core = h @ w2 + b2
    return core + inp if pre_lnorm else ln(inp + core)


if __name__ == "__main__":
    # Small, TPU-friendly shapes: d_model=128, d_inner=256.
    d_model, d_inner = 128, 256
    key = jax.random.PRNGKey(0)
    k_in, k_w1, k_b1, k_w2, k_b2 = jax.random.split(key, 5)

    w1 = jax.random.normal(k_w1, (d_model, d_inner), dtype=jnp.float32) * 0.02
    b1 = jax.random.normal(k_b1, (d_inner,), dtype=jnp.float32) * 0.01
    w2 = jax.random.normal(k_w2, (d_inner, d_model), dtype=jnp.float32) * 0.02
    b2 = jax.random.normal(k_b2, (d_model,), dtype=jnp.float32) * 0.01
    gamma = jnp.ones((d_model,), dtype=jnp.float32)
    beta = jnp.zeros((d_model,), dtype=jnp.float32)

    # --- Test 1: f32, post-lnorm, auto tile (16 rows -> 2-step grid) ---
    inp = jax.random.normal(k_in, (8, 2, d_model), dtype=jnp.float32)
    out = positionwise_ff(inp, w1, b1, w2, b2, gamma, beta,
                          eps=1e-5, pre_lnorm=False)
    jax.block_until_ready(out)
    ref = _reference(inp, w1, b1, w2, b2, gamma, beta, eps=1e-5, pre_lnorm=False)
    assert out.shape == inp.shape and out.dtype == inp.dtype
    assert jnp.allclose(out, ref, atol=1e-4, rtol=1e-4), "post-lnorm mismatch"

    # --- Test 2: f32, pre-lnorm, explicit tile + row padding (72 rows, tile 64) ---
    inp2 = jax.random.normal(jax.random.PRNGKey(1), (24, 3, d_model),
                             dtype=jnp.float32)
    out2 = positionwise_ff(inp2, w1, b1, w2, b2, gamma, beta,
                           eps=1e-5, pre_lnorm=True, row_tile=64)
    jax.block_until_ready(out2)
    ref2 = _reference(inp2, w1, b1, w2, b2, gamma, beta, eps=1e-5, pre_lnorm=True)
    assert out2.shape == inp2.shape
    assert jnp.allclose(out2, ref2, atol=1e-4, rtol=1e-4), "pre-lnorm mismatch"

    # --- Test 3: bf16 inputs/weights (matched-dtype full-rate MXU path) ---
    inp_bf = inp.astype(jnp.bfloat16)
    out_bf = positionwise_ff(inp_bf, w1.astype(jnp.bfloat16),
                             b1.astype(jnp.bfloat16), w2.astype(jnp.bfloat16),
                             b2.astype(jnp.bfloat16), gamma.astype(jnp.bfloat16),
                             beta.astype(jnp.bfloat16),
                             eps=1e-5, pre_lnorm=False)
    jax.block_until_ready(out_bf)
    ref_bf = _reference(inp_bf, w1.astype(jnp.bfloat16), b1.astype(jnp.bfloat16),
                        w2.astype(jnp.bfloat16), b2.astype(jnp.bfloat16),
                        gamma.astype(jnp.bfloat16), beta.astype(jnp.bfloat16),
                        eps=1e-5, pre_lnorm=False)
    assert out_bf.dtype == jnp.bfloat16
    assert jnp.allclose(out_bf.astype(jnp.float32), ref_bf,
                        atol=5e-2, rtol=5e-2), "bf16 mismatch"

    print("KERNEL_OK")
</pallas_src>

<mosaic_0001>
module attributes {stable_mosaic.version = 11 : i64} {
  func.func @_ff_kernel(%arg0: i32, %arg1: memref<8x128xf32, #tpu.memory_space<vmem>>, %arg2: memref<128x256xf32, #tpu.memory_space<vmem>>, %arg3: memref<1x256xf32, #tpu.memory_space<vmem>>, %arg4: memref<256x128xf32, #tpu.memory_space<vmem>>, %arg5: memref<3x128xf32, #tpu.memory_space<vmem>>, %arg6: memref<8x128xf32, #tpu.memory_space<vmem>>) attributes {dimension_semantics = [#tpu.dimension_semantics<parallel>], iteration_bounds = array<i64: 2>, scalar_prefetch = 0 : i64, scratch_operands = 0 : i64, tpu.core_type = #tpu.core_type<tc>, window_params = [{transform_indices = @transform_0, window_bounds = array<i64: 8, 128>}, {pipeline_mode = #tpu.pipeline_mode<synchronous>, transform_indices = @transform_1, window_bounds = array<i64: 128, 256>}, {pipeline_mode = #tpu.pipeline_mode<synchronous>, transform_indices = @transform_2, window_bounds = array<i64: 1, 256>}, {pipeline_mode = #tpu.pipeline_mode<synchronous>, transform_indices = @transform_3, window_bounds = array<i64: 256, 128>}, {pipeline_mode = #tpu.pipeline_mode<synchronous>, transform_indices = @transform_4, window_bounds = array<i64: 3, 128>}, {transform_indices = @transform_5, window_bounds = array<i64: 8, 128>}]} {
    %c0 = arith.constant 0 : index
    %c0_0 = arith.constant 0 : index
    %0 = vector.load %arg1[%c0, %c0_0] : memref<8x128xf32, #tpu.memory_space<vmem>>, vector<8x128xf32>
    %c0_1 = arith.constant 0 : index
    %c0_2 = arith.constant 0 : index
    %1 = vector.load %arg5[%c0_1, %c0_2] : memref<3x128xf32, #tpu.memory_space<vmem>>, vector<3x128xf32>
    %2 = vector.extract_strided_slice %1 {offsets = [0, 0], sizes = [1, 128], strides = [1, 1]} : vector<3x128xf32> to vector<1x128xf32>
    %3 = vector.extract_strided_slice %1 {offsets = [1, 0], sizes = [1, 128], strides = [1, 1]} : vector<3x128xf32> to vector<1x128xf32>
    %4 = vector.extract_strided_slice %1 {offsets = [2, 0], sizes = [1, 128], strides = [1, 1]} : vector<3x128xf32> to vector<1x128xf32>
    %c0_3 = arith.constant 0 : index
    %c0_4 = arith.constant 0 : index
    %5 = vector.load %arg3[%c0_3, %c0_4] : memref<1x256xf32, #tpu.memory_space<vmem>>, vector<1x256xf32>
    %c0_5 = arith.constant 0 : index
    %c0_6 = arith.constant 0 : index
    %6 = vector.load %arg2[%c0_5, %c0_6] : memref<128x256xf32, #tpu.memory_space<vmem>>, vector<128x256xf32>
    %cst = arith.constant dense<0.000000e+00> : vector<8x256xf32>
    %7 = tpu.matmul %0, %6, %cst {dimension_numbers = #tpu.dot_dimension_numbers<[1], [0], [0], [1], [0, 0, 1, 1], [], []>} : vector<8x128xf32>, vector<128x256xf32>, vector<8x256xf32> -> vector<8x256xf32>
    %8 = vector.broadcast %5 : vector<1x256xf32> to vector<8x256xf32>
    %9 = arith.addf %7, %8 : vector<8x256xf32>
    %cst_7 = arith.constant 0.000000e+00 : f32
    %10 = vector.broadcast %cst_7 : f32 to vector<8x256xf32>
    %11 = arith.maximumf %9, %10 : vector<8x256xf32>
    %c0_8 = arith.constant 0 : index
    %c0_9 = arith.constant 0 : index
    %12 = vector.load %arg4[%c0_8, %c0_9] : memref<256x128xf32, #tpu.memory_space<vmem>>, vector<256x128xf32>
    %cst_10 = arith.constant dense<0.000000e+00> : vector<8x128xf32>
    %13 = tpu.matmul %11, %12, %cst_10 {dimension_numbers = #tpu.dot_dimension_numbers<[1], [0], [0], [1], [0, 0, 1, 1], [], []>} : vector<8x256xf32>, vector<256x128xf32>, vector<8x128xf32> -> vector<8x128xf32>
    %14 = vector.broadcast %2 : vector<1x128xf32> to vector<8x128xf32>
    %15 = arith.addf %13, %14 : vector<8x128xf32>
    %16 = arith.addf %0, %15 : vector<8x128xf32>
    %cst_11 = arith.constant dense<0.000000e+00> : vector<8xf32>
    %17 = vector.multi_reduction <add>, %16, %cst_11 [1] : vector<8x128xf32> to vector<8xf32>
    %18 = vector.shape_cast %17 : vector<8xf32> to vector<8x1xf32>
    %cst_12 = arith.constant 1.280000e+02 : f32
    %19 = vector.broadcast %cst_12 : f32 to vector<8x1xf32>
    %20 = arith.divf %18, %19 : vector<8x1xf32>
    %21 = arith.mulf %16, %16 : vector<8x128xf32>
    %cst_13 = arith.constant dense<0.000000e+00> : vector<8xf32>
    %22 = vector.multi_reduction <add>, %21, %cst_13 [1] : vector<8x128xf32> to vector<8xf32>
    %23 = vector.shape_cast %22 : vector<8xf32> to vector<8x1xf32>
    %cst_14 = arith.constant 1.280000e+02 : f32
    %24 = vector.broadcast %cst_14 : f32 to vector<8x1xf32>
    %25 = arith.divf %23, %24 : vector<8x1xf32>
    %26 = arith.mulf %20, %20 : vector<8x1xf32>
    %27 = arith.subf %25, %26 : vector<8x1xf32>
    %cst_15 = arith.constant 0.000000e+00 : f32
    %28 = vector.broadcast %cst_15 : f32 to vector<8x1xf32>
    %29 = arith.maximumf %27, %28 : vector<8x1xf32>
    %30 = vector.broadcast %20 : vector<8x1xf32> to vector<8x128xf32>
    %31 = arith.subf %16, %30 : vector<8x128xf32>
    %cst_16 = arith.constant 9.99999974E-6 : f32
    %32 = vector.broadcast %cst_16 : f32 to vector<8x1xf32>
    %33 = arith.addf %29, %32 : vector<8x1xf32>
    %34 = math.rsqrt %33 : vector<8x1xf32>
    %35 = vector.broadcast %34 : vector<8x1xf32> to vector<8x128xf32>
    %36 = arith.mulf %31, %35 : vector<8x128xf32>
    %37 = vector.broadcast %3 : vector<1x128xf32> to vector<8x128xf32>
    %38 = arith.mulf %36, %37 : vector<8x128xf32>
    %39 = vector.broadcast %4 : vector<1x128xf32> to vector<8x128xf32>
    %40 = arith.addf %38, %39 : vector<8x128xf32>
    %c0_17 = arith.constant 0 : index
    %c0_18 = arith.constant 0 : index
    %41 = vector.load %arg6[%c0_17, %c0_18] : memref<8x128xf32, #tpu.memory_space<vmem>>, vector<8x128xf32>
    tpu.vector_store %arg6[%c0_17, %c0_18], %40 {strides = array<i32>} : memref<8x128xf32, #tpu.memory_space<vmem>>, vector<8x128xf32>,
    return
  }
  func.func @transform_0(%arg0: i32) -> (i32, i32) {
    %c0_i32 = arith.constant 0 : i32
    %c0_i32_0 = arith.constant 0 : i32
    return %arg0, %c0_i32 : i32, i32
  }
  func.func @transform_1(%arg0: i32) -> (i32, i32) {
    %c0_i32 = arith.constant 0 : i32
    %c0_i32_0 = arith.constant 0 : i32
    %c0_i32_1 = arith.constant 0 : i32
    return %c0_i32, %c0_i32_0 : i32, i32
  }
  func.func @transform_2(%arg0: i32) -> (i32, i32) {
    %c0_i32 = arith.constant 0 : i32
    %c0_i32_0 = arith.constant 0 : i32
    %c0_i32_1 = arith.constant 0 : i32
    return %c0_i32, %c0_i32_0 : i32, i32
  }
  func.func @transform_3(%arg0: i32) -> (i32, i32) {
    %c0_i32 = arith.constant 0 : i32
    %c0_i32_0 = arith.constant 0 : i32
    %c0_i32_1 = arith.constant 0 : i32
    return %c0_i32, %c0_i32_0 : i32, i32
  }
  func.func @transform_4(%arg0: i32) -> (i32, i32) {
    %c0_i32 = arith.constant 0 : i32
    %c0_i32_0 = arith.constant 0 : i32
    %c0_i32_1 = arith.constant 0 : i32
    return %c0_i32, %c0_i32_0 : i32, i32
  }
  func.func @transform_5(%arg0: i32) -> (i32, i32) {
    %c0_i32 = arith.constant 0 : i32
    %c0_i32_0 = arith.constant 0 : i32
    return %arg0, %c0_i32 : i32, i32
  }
}

</mosaic_0001>

<bundles_post_ra>
// kernel: tpu_custom_call.1
= control target key start
LH: loop header
LB: loop body
LE: loop exit
PB: predicated region body
PF: predicated region fallthrough
CT: control target
= control target key end

     0   :  { %10 = vsyncpa [#allocation3], 0  ;;  %s1252_s0 = inlined_call_operand.hbm [shape: f32[16,128], index: 0, kind: input, shape index: {}]   ;;  %s1253_s1 = inlined_call_operand.hbm [shape: f32[128,256], index: 1, kind: input, shape index: {}]   ;;  %s1254_s2 = inlined_call_operand.vmem [shape: f32[1,256], index: 2, kind: input, shape index: {}]   ;;  %s1255_s3 = inlined_call_operand.hbm [shape: f32[256,128], index: 3, kind: input, shape index: {}]   ;;  %s1256_s4 = inlined_call_operand.vmem [shape: f32[3,128], index: 4, kind: input, shape index: {}]   ;;  %s1257_s5 = inlined_call_operand.hbm [shape: f32[16,128], index: 5, kind: output, shape index: {}]  }
   0x1   :  { %12 = vsyncpa [#allocation3 + $0x1], 0 }
   0x2   :  { %13 = vsyncpa [#allocation6], 0 }
   0x3   :  { %14 = vsyncpa [#allocation4], 0 }
   0x4   :  { %16 = vsyncpa [#allocation4 + $0x1], 0  ;;  %s1010_s18 = smov 0   ;;  %s1012_s19 = smov 0  }
   0x5   :  { %s1014_s20 = smov 0   ;;  %s1016_s21 = smov 0  }
   0x6 LB: > { %s1031_s22 = sadd.s32 4294967295, %s969_s21   ;;  %s624_s23 = sadd.s32 4294967294, %s969_s21   ;;  %s969_s21 = sphi %s1016_s21, %s1277_s21   ;;  %s965_s20 = sphi %s1014_s20, %s1276_s20   ;;  %s961_s19 = sphi %s1012_s19, %s1275_s19   ;;  %s957_s18 = sphi %s1010_s18, %s1274_s18  }
   0x7   : > { %p42_p0 = scmp.ne.s32.totalorder %s961_s19, %s957_s18  ;;  %p1258_p1 = scmp.eq.s32.totalorder %s1031_s22, 0 }
   0x8   : > { %p156_p3 = scmp.eq.s32.totalorder %s624_s23, 1  ;;  %p625_p5 = scmp.ge.s32.totalorder %s969_s21, 1 }
   0x9   : > { %p1040_p4 = por %p1258_p1, %p42_p0  ;;  %p163_p7 = scmp.lt.s32.totalorder %s969_s21, 3 }
   0xa   : > { %p1045_p6 = por %p156_p3, %p42_p0  ;;  %s971_s27 = smov [#allocation5]  }
   0xb   : > { %s1261_s24 = scalar_select %p1040_p4, 1, 0 }
   0xc   : > { %s1262_s25 = scalar_select %p1045_p6, 1, 0 }
   0xd   : > { %p1050_p8 = pnand %p625_p5, %p163_p7  ;;  %s175_s28 = sshll.u32 %s971_s27, 4  ;;  %s1054_s28 = int_to_ptr.vmem [resolvable:$true] %s175_s28 }
   0xe   : > { %s972_s30 = smov [#allocation7]   ;;  %s813_s9 = scalar_lea.hbm %s1253_s1, 4096 }
   0xf   : > { %p751_p9 = pneg %p1050_p8  ;;  %s191_s6 = sshll.u32 %s972_s30, 4  ;;  %s1065_s6 = int_to_ptr.vmem [resolvable:$true] %s191_s6 }
  0x10   : > { %p814_p12 = scmp.ne.s32.totalorder %s1253_s1, %s813_s9  ;;  %p820_p5 = scmp.lt.u32.totalorder %s813_s9, %s1253_s1 }
  0x11   : > { %p1061_p11 = pnand %p751_p9, %p1258_p1 }
  0x13   : > { %p815_p13 = pneg %p1061_p11 }
  0x15   : > { %p816_p0 = pnand %p815_p13, %p814_p12 }
  0x17   : > { %p817_p3 = pneg %p816_p0 }
  0x19   : > { %p822_p7 = pnand %p820_p5, %p817_p3 }
  0x1b   : > { %825 = shalt.err (!%p822_p7)
}
  0x1c   : > { %s826_s14 = scalar_lea.vmem %s1054_s28, 4096  ;;  %p834_p2 = scmp.lt.s32.totalorder %s1054_s28, %s1054_s28 }
  0x1d   : > { %p827_p9 = scmp.ne.s32.totalorder %s1054_s28, %s826_s14  ;;  %p835_p12 = scmp.lt.s32.totalorder %s826_s14, %s826_s14 }
  0x1f   : > { %p829_p10 = pnand %p827_p9, %p815_p13  ;;  %p836_p0 = por %p835_p12, %p834_p2 }
  0x21   : > { %p830_p1 = pneg %p829_p10 }
  0x23   : > { %p837_p6 = pnand %p836_p0, %p830_p1 }
  0x25   : > { %840 = shalt.err (!%p837_p6)
}
  0x26   : > { %s973_s15 = smov 256   ;;  %s974_s16 = smov 16  }
  0x27   : > { %754 = dma.hbm_to_vmem [thread:$0]  (!%p1061_p11), %s1253_s1, 4096, %s1054_s28, [#allocation6], %s973_s15, %s973_s15, %s974_s16  }
  0x28   : > { %s841_s7 = scalar_lea.hbm %s1255_s3, 4096 }
  0x29   : > { %p842_p2 = scmp.ne.s32.totalorder %s1255_s3, %s841_s7  ;;  %p848_p10 = scmp.lt.u32.totalorder %s841_s7, %s1255_s3 }
  0x2b   : > { %p844_p1 = pnand %p842_p2, %p815_p13 }
  0x2d   : > { %p845_p6 = pneg %p844_p1 }
  0x2f   : > { %p850_p3 = pnand %p848_p10, %p845_p6 }
  0x31   : > { %853 = shalt.err (!%p850_p3)
}
  0x32   : > { %s854_s28 = scalar_lea.vmem %s1065_s6, 4096  ;;  %p862_p12 = scmp.lt.s32.totalorder %s1065_s6, %s1065_s6 }
  0x33   : > { %p855_p5 = scmp.ne.s32.totalorder %s1065_s6, %s854_s28  ;;  %p863_p0 = scmp.lt.s32.totalorder %s854_s28, %s854_s28 }
  0x35   : > { %p857_p7 = pnand %p855_p5, %p815_p13  ;;  %p864_p2 = por %p863_p0, %p862_p12 }
  0x37   : > { %p858_p9 = pneg %p857_p7 }
  0x39   : > { %p865_p1 = pnand %p864_p2, %p858_p9 }
  0x3b   : > { %868 = shalt.err (!%p865_p1)
}
  0x3c   : > { %s975_s12 = smov 128   ;;  %s976_s13 = smov 8  }
  0x3d   : > { %757 = dma.hbm_to_vmem [thread:$0]  (!%p1061_p11), %s1255_s3, 4096, %s1065_s6, [#allocation6], %s975_s12, %s975_s12, %s976_s13  }
  0x3e   : > { %s1120_s16 = sadd.s32 1, %s969_s21   ;;  %s29_s23 = sadd.s32 1, %s965_s20 }
  0x3f   : > { %s26_s17 = ssub.s32 %s969_s21, %s1120_s16  ;;  %p36_p6 = scmp.ne.s32.totalorder %s965_s20, %s961_s19 }
  0x40   : > { %p27_p13 = scmp.eq.s32.totalorder %s26_s17, 0  ;;  %p37_p10 = scmp.eq.s32.totalorder %s969_s21, 0 }
  0x41   : > { %p1265_p5 = scmp.eq.s32.totalorder %s1031_s22, 1  ;;  %p768_p9 = scmp.lt.s32.totalorder %s969_s21, 2 }
  0x42   : > { %s1129_s27 = scalar_select %p27_p13, %s965_s20, %s29_s23  }
  0x43   : > { %p38_p3 = por %p37_p10, %p36_p6  ;;  %p1133_p7 = por %p1265_p5, %p36_p6 }
  0x44   : > { %s208_s29 = sand.u32 1, %s965_s20   ;;  %s630_s6 = sshll.u32 %s969_s21, 7 }
  0x45   : > { %s1266_s30 = scalar_select %p1133_p7, 1, 0 }
  0x46   : > { %s629_s7 = sshll.u32 %s208_s29, 3  ;;  %s1143_s10 = scalar_lea.hbm %s1252_s0, %s630_s6 }
  0x47   : > { %s212_s11 = scalar_lea.vmem [#allocation2], %s629_s7  ;;  %p1147_p11 = pnand %p768_p9, %p38_p3 }
  0x48   : > { %s219_s28 = sshll.u32 %s212_s11, 4  ;;  %s209_s13 = scalar_lea.sflag [#allocation3], %s208_s29  ;;  %s1145_s28 = int_to_ptr.vmem [resolvable:$true] %s219_s28 }
  0x49   : > { %s869_s14 = scalar_lea.hbm %s1143_s10, 128  ;;  %p871_p0 = pneg %p1147_p11 }
  0x4a   : > { %p870_p12 = scmp.ne.s32.totalorder %s1143_s10, %s869_s14  ;;  %s874_s23 = scalar_lea.hbm %s1252_s0, 256 }
  0x4b   : > { %p875_p13 = scmp.lt.u32.totalorder %s1143_s10, %s1252_s0  ;;  %p876_p6 = scmp.lt.u32.totalorder %s874_s23, %s869_s14 }
  0x4c   : > { %p872_p2 = pnand %p871_p0, %p870_p12  ;;  %p878_p3 = scmp.lt.u32.totalorder %s869_s14, %s1143_s10 }
  0x4d   : > { %p877_p10 = por %p876_p6, %p875_p13 }
  0x4e   : > { %p873_p1 = pneg %p872_p2 }
  0x4f   : > { %p879_p5 = por %p878_p3, %p877_p10 }
  0x51   : > { %p880_p9 = pnand %p879_p5, %p873_p1 }
  0x53   : > { %883 = shalt.err (!%p880_p9)
}
  0x54   : > { %s884_s29 = scalar_lea.vmem %s1145_s28, 128  ;;  %s977_s8 = smov [#allocation2]  }
  0x55   : > { %p885_p12 = scmp.ne.s32.totalorder %s1145_s28, %s884_s29  ;;  %s889_s9 = sshll.u32 %s977_s8, 4  ;;  %s890_s9 = int_to_ptr.vmem [resolvable:$false] %s889_s9 }
  0x56   : > { %s891_s11 = scalar_lea.vmem %s890_s9, 256  ;;  %p892_p4 = scmp.lt.s32.totalorder %s1145_s28, %s890_s9 }
  0x57   : > { %p887_p2 = pnand %p885_p12, %p871_p0  ;;  %p893_p13 = scmp.lt.s32.totalorder %s891_s11, %s884_s29 }
  0x59   : > { %p888_p7 = pneg %p887_p2  ;;  %p894_p6 = por %p893_p13, %p892_p4 }
  0x5b   : > { %p895_p10 = pnand %p894_p6, %p888_p7 }
  0x5d   : > { %898 = shalt.err (!%p895_p10)
}
  0x5e   : > { %761 = dma.hbm_to_vmem [thread:$0]  (!%p1147_p11), %s1143_s10, 128, %s1145_s28, %s209_s13  }
  0x5f   : > { %228 = sbr.rel (%p1050_p8) target bundleno = 763 (0x2fb), region = 40  ;;  %s1179_s14 = sand.u32 (!%p1050_p8), 1, %s961_s19  }
  0x60   : > { %s632_s15 = sshll.u32 (!%p1050_p8), %s1179_s14, 3  ;;  %s231_s17 = scalar_lea.sflag (!%p1050_p8), [#allocation3], %s1179_s14 }
  0x61   : > { %s1185_s23 = scalar_lea.vmem (!%p1050_p8), [#allocation2], %s632_s15  ;;  %p1268_p4 = scmp.ne.s32.totalorder (!%p1050_p8), %s1261_s24, 0 }
  0x66   : > { %944 = dma.done.wait (%p1268_p4), %s231_s17, 128  }
  0x67   : > { %946 = vsyncadd (%p1268_p4), %s231_s17, 4294967168  ;;  %p1269_p7 = scmp.eq.s32.totalorder %s1031_s22, 0 }
  0x69   : > { %948 = dma.done.wait (%p1269_p7), [#allocation6], 8192   ;;  %p1270_p8 = pmov %p1269_p7 }
  0x6a   : > { %v978_v0 = vmov 0.0   ;;  %v273_v1 = vld [vmem:[#allocation5 + $0x8] sm:$0xff]  ;;  %v275_v2 = vld [vmem:[#allocation5 + $0x18] sm:$0xff]  ;;  %v272_v3 = vld [vmem:[#allocation5] sm:$0xff]  ;;  %s637_s12 = sshll.u32 %s1031_s22, 7  ;;  %s268_s13 = scalar_lea.vmem [#allocation8], %s632_s15 }
  0x6b   : > { %950 = vsyncadd (%p1270_p8), [#allocation6], 4294959104  ;;  %379 = vmatprep.mubr.f32.mxu0 %v978_v0  ;;  %v675_v4 = vpack.c.bf16 %v275_v2, %v273_v1  ;;  %v274_v5 = vld [vmem:[#allocation5 + $0x10] sm:$0xff]  ;;  %v277_v6 = vld [vmem:[#allocation5 + $0x28] sm:$0xff]  ;;  %s535_s7 = sshll.u32 %s268_s13, 4  ;;  %s1208_s8 = scalar_lea.hbm %s1257_s5, %s637_s12  ;;  %s1210_s7 = int_to_ptr.vmem [resolvable:$true] %s535_s7 }
  0x6c   : > { %v279_v7 = vld [vmem:[#allocation5 + $0x38] sm:$0xff]  ;;  %v677_v8 = vpack.c.bf16 %v274_v5, %v272_v3  ;;  %v276_v10 = vld [vmem:[#allocation5 + $0x20] sm:$0xff]  ;;  %v278_v11 = vld [vmem:[#allocation5 + $0x30] sm:$0xff]  ;;  %s522_s9 = scalar_lea.sflag [#allocation4], %s1179_s14  ;;  %s899_s11 = scalar_lea.vmem %s1210_s7, 128 }
  0x6d   : > { %v679_v9 = vpack.c.bf16 %v279_v7, %v277_v6  ;;  %v281_v12 = vld [vmem:[#allocation5 + $0x48] sm:$0xff]  ;;  %676 = vmatprep.subr.bf16.mxu0 %v675_v4  ;;  %v283_v13 = vld [vmem:[#allocation5 + $0x58] sm:$0xff]  ;;  %v681_v14 = vpack.c.bf16 %v278_v11, %v276_v10  ;;  %v280_v16 = vld [vmem:[#allocation5 + $0x40] sm:$0xff]  ;;  %p900_p11 = scmp.ne.s32.totalorder %s1210_s7, %s899_s11  ;;  %p1271_p0 = scmp.ne.s32.totalorder %s1266_s30, 0 }
  0x6e   : > { %678 = vmatpush1.bf16.msra.mxu0 %v677_v8  ;;  %v683_v15 = vpack.c.bf16 %v283_v13, %v281_v12  ;;  %v282_v17 = vld [vmem:[#allocation5 + $0x50] sm:$0xff]  ;;  %v285_v18 = vld [vmem:[#allocation5 + $0x68] sm:$0xff]  ;;  %v287_v19 = vld [vmem:[#allocation5 + $0x78] sm:$0xff]  ;;  %s979_s22 = smov [#allocation8]  }
  0x6f   : > { %680 = vmatprep.subr.bf16.mxu0 %v679_v9  ;;  %v685_v20 = vpack.c.bf16 %v282_v17, %v280_v16  ;;  %v687_v21 = vpack.c.bf16 %v287_v19, %v285_v18  ;;  %v284_v22 = vld [vmem:[#allocation5 + $0x60] sm:$0xff]  ;;  %v286_v23 = vld [vmem:[#allocation5 + $0x70] sm:$0xff]  ;;  %v289_v24 = vld [vmem:[#allocation5 + $0x88] sm:$0xff]  ;;  %p901_p1 = pnand %p900_p11, %p1271_p0  ;;  %s903_s15 = sshll.u32 %s979_s22, 4  ;;  %s904_s15 = int_to_ptr.vmem [resolvable:$false] %s903_s15 }
  0x70   : > { %v291_v25 = vld [vmem:[#allocation5 + $0x98] sm:$0xff]  ;;  %v288_v26 = vld [vmem:[#allocation5 + $0x80] sm:$0xff]  ;;  %v290_v27 = vld [vmem:[#allocation5 + $0x90] sm:$0xff]  ;;  %v689_v31 = vpack.c.bf16 %v286_v23, %v284_v22  ;;  %s905_s17 = scalar_lea.vmem %s904_s15, 256  ;;  %p906_p5 = scmp.lt.s32.totalorder %s1210_s7, %s904_s15 }
  0x71   : > { %v404_v28 = vld [vmem:[#allocation7 + $0x80] sm:$0xff]  ;;  %v405_v29 = vld [vmem:[#allocation7 + $0x88] sm:$0xff]  ;;  %v406_v34 = vld [vmem:[#allocation7 + $0x90] sm:$0xff]  ;;  %v691_v36 = vpack.c.bf16 %v291_v25, %v289_v24  ;;  %v693_v46 = vpack.c.bf16 %v290_v27, %v288_v26  ;;  %p902_p3 = pneg %p901_p1  ;;  %p907_p9 = scmp.lt.s32.totalorder %s905_s17, %s899_s11 }
  0x72   : > { %682 = vmatpush1.bf16.msra.mxu0 %v681_v14  ;;  %v388_v30 = vld [vmem:[#allocation7] sm:$0xff]  ;;  %v707_v32 = vpack.c.bf16 %v405_v29, %v404_v28  ;;  %v389_v33 = vld [vmem:[#allocation7 + $0x8] sm:$0xff]  ;;  %v407_v35 = vld [vmem:[#allocation7 + $0x98] sm:$0xff] }
  0x73   : > { %684 = vmatprep.subr.bf16.mxu0 %v683_v15  ;;  %v709_v37 = vpack.c.bf16 %v389_v33, %v388_v30  ;;  %v711_v38 = vpack.c.bf16 %v407_v35, %v406_v34  ;;  %v390_v39 = vld [vmem:[#allocation7 + $0x10] sm:$0xff]  ;;  %v391_v40 = vld [vmem:[#allocation7 + $0x18] sm:$0xff]  ;;  %v408_v41 = vld [vmem:[#allocation7 + $0xa0] sm:$0xff]  ;;  %v305_v34 = vlaneseq  ;;  %p908_p12 = por %p907_p9, %p906_p5 }
  0x74   : > { %v293_v42 = vld [vmem:[#allocation5 + $0xa8] sm:$0xff]  ;;  %v295_v43 = vld [vmem:[#allocation5 + $0xb8] sm:$0xff]  ;;  %708 = vmatprep.subr.bf16.mxu1 %v707_v32  ;;  %v713_v45 = vpack.c.bf16 %v391_v40, %v390_v39  ;;  %v292_v47 = vld [vmem:[#allocation5 + $0xa0] sm:$0xff] }
  0x75   : > { %v409_v44 = vld [vmem:[#allocation7 + $0xa8] sm:$0xff]  ;;  %710 = vmatpush3.bf16.msra.mxu1 %v709_v37  ;;  %v392_v49 = vld [vmem:[#allocation7 + $0x20] sm:$0xff]  ;;  %v695_v51 = vpack.c.bf16 %v295_v43, %v293_v42  ;;  %v294_v52 = vld [vmem:[#allocation5 + $0xb0] sm:$0xff]  ;;  %v306_v35 = vshrl.u32 %v305_v34, 7  ;;  %p909_p2 = pnand %p908_p12, %p902_p3 }
  0x76   : > { %686 = vmatpush1.bf16.msra.mxu0 %v685_v20  ;;  %712 = vmatprep.subr.bf16.mxu1 %v711_v38  ;;  %v715_v48 = vpack.c.bf16 %v409_v44, %v408_v41  ;;  %v393_v50 = vld [vmem:[#allocation7 + $0x28] sm:$0xff]  ;;  %v410_v53 = vld [vmem:[#allocation7 + $0xb0] sm:$0xff]  ;;  %v411_v54 = vld [vmem:[#allocation7 + $0xb8] sm:$0xff]  ;;  %v697_v58 = vpack.c.bf16 %v294_v52, %v292_v47 }
  0x77   : > { %688 = vmatprep.subr.bf16.mxu0 %v687_v21  ;;  %v297_v55 = vld [vmem:[#allocation5 + $0xc8] sm:$0xff]  ;;  %v299_v56 = vld [vmem:[#allocation5 + $0xd8] sm:$0xff]  ;;  %v717_v57 = vpack.c.bf16 %v393_v50, %v392_v49  ;;  %v296_v59 = vld [vmem:[#allocation5 + $0xc0] sm:$0xff]  ;;  %v719_v60 = vpack.c.bf16 %v411_v54, %v410_v53  ;;  %v311_v38 = vsub.s32 1, %v306_v35 }
  0x78   : > { %v394_v61 = vld [vmem:[#allocation7 + $0x30] sm:$0xff]  ;;  %v395_v62 = vld [vmem:[#allocation7 + $0x38] sm:$0xff]  ;;  %v699_v63 = vpack.c.bf16 %v299_v56, %v297_v55  ;;  %v412_v1 = vld [vmem:[#allocation7 + $0xc0] sm:$0xff] }
  0x79   : > { %714 = vmatpush3.bf16.msra.mxu1 %v713_v45  ;;  %v298_v0 = vld [vmem:[#allocation5 + $0xd0] sm:$0xff]  ;;  %v413_v2 = vld [vmem:[#allocation7 + $0xc8] sm:$0xff]  ;;  %v303_v4 = vld [vmem:[#allocation5 + $0xf8] sm:$0xff]  ;;  %v721_v5 = vpack.c.bf16 %v395_v62, %v394_v61 }
  0x7a   : > { %690 = vmatpush1.bf16.msra.mxu0 %v689_v31  ;;  %716 = vmatprep.subr.bf16.mxu1 %v715_v48  ;;  %v301_v3 = vld [vmem:[#allocation5 + $0xe8] sm:$0xff]  ;;  %v701_v6 = vpack.c.bf16 %v298_v0, %v296_v59  ;;  %v300_v7 = vld [vmem:[#allocation5 + $0xe0] sm:$0xff]  ;;  %v723_v8 = vpack.c.bf16 %v413_v2, %v412_v1  ;;  %v302_v12 = vld [vmem:[#allocation5 + $0xf0] sm:$0xff] }
  0x7b   : > { %692 = vmatprep.subr.bf16.mxu0 %v691_v36  ;;  %v396_v9 = vld [vmem:[#allocation7 + $0x40] sm:$0xff]  ;;  %v397_v10 = vld [vmem:[#allocation7 + $0x48] sm:$0xff]  ;;  %v703_v11 = vpack.c.bf16 %v303_v4, %v301_v3  ;;  %v414_v13 = vld [vmem:[#allocation7 + $0xd0] sm:$0xff]  ;;  %v705_v16 = vpack.c.bf16 %v302_v12, %v300_v7  ;;  %v307_v36 = vsub.s32 0, %v306_v35 }
  0x7c   : > { %v415_v14 = vld [vmem:[#allocation7 + $0xd8] sm:$0xff]  ;;  %v725_v15 = vpack.c.bf16 %v397_v10, %v396_v9  ;;  %v398_v18 = vld [vmem:[#allocation7 + $0x50] sm:$0xff]  ;;  %v416_v20 = vld [vmem:[#allocation7 + $0xe0] sm:$0xff] }
  0x7d   : > { %718 = vmatpush3.bf16.msra.mxu1 %v717_v57  ;;  %v727_v17 = vpack.c.bf16 %v415_v14, %v414_v13  ;;  %v399_v19 = vld [vmem:[#allocation7 + $0x58] sm:$0xff]  ;;  %v417_v21 = vld [vmem:[#allocation7 + $0xe8] sm:$0xff]  ;;  %v400_v25 = vld [vmem:[#allocation7 + $0x60] sm:$0xff] }
  0x7e   : > { %694 = vmatpush1.bf16.msra.mxu0 %v693_v46  ;;  %720 = vmatprep.subr.bf16.mxu1 %v719_v60  ;;  %v729_v22 = vpack.c.bf16 %v399_v19, %v398_v18  ;;  %v269_v23 = vld [vmem:[%s1185_s23] sm:$0xff]  ;;  %v731_v24 = vpack.c.bf16 %v417_v21, %v416_v20  ;;  %v401_v26 = vld [vmem:[#allocation7 + $0x68] sm:$0xff] }
  0x7f   : > { %696 = vmatprep.subr.bf16.mxu0 %v695_v51  ;;  %v733_v27 = vpack.c.bf16 %v401_v26, %v400_v25  ;;  %v418_v28 = vld [vmem:[#allocation7 + $0xf0] sm:$0xff]  ;;  %v419_v29 = vld [vmem:[#allocation7 + $0xf8] sm:$0xff] }
  0x80   : > { %v735_v30 = vpack.c.bf16 %v419_v29, %v418_v28  ;;  %v402_v31 = vld [vmem:[#allocation7 + $0x70] sm:$0xff]  ;;  %v403_v32 = vld [vmem:[#allocation7 + $0x78] sm:$0xff] }
  0x81   : > { %722 = vmatpush3.bf16.msra.mxu1 %v721_v5  ;;  %v737_v33 = vpack.c.bf16 %v403_v32, %v402_v31  ;;  %v271_v37 = vld [vmem:[%s1254_s2] sm:$0x3] }
  0x82   : > { %698 = vmatpush1.bf16.msra.mxu0 %v697_v58  ;;  %724 = vmatprep.subr.bf16.mxu1 %v723_v8  ;;  %v308_v39 = vrot.slane %v271_v37, %v307_v36  ;;  %v312_v40 = vrot.slane %v271_v37, %v311_v38  ;;  %v270_v47 = vld [vmem:[%s1256_s4] sm:$0x7] }
  0x83   : > { %700 = vmatprep.subr.bf16.mxu0 %v699_v63  ;;  %v423_v49 = vrot.slane %v270_v47, %v307_v36  ;;  %v517_v63 = vsub.s32 2, %v306_v35  ;;  %v513_v0 = vrot.slane %v270_v47, %v311_v38 }
  0x85   : > { %726 = vmatpush3.bf16.msra.mxu1 %v725_v15  ;;  %v518_v3 = vrot.slane %v270_v47, %v517_v63 }
  0x86   : > { %702 = vmatpush1.bf16.msra.mxu0 %v701_v6  ;;  %728 = vmatprep.subr.bf16.mxu1 %v727_v17 }
  0x87   : > { %704 = vmatprep.subr.bf16.mxu0 %v703_v11 }
  0x89   : > { %730 = vmatpush3.bf16.msra.mxu1 %v729_v22 }
  0x8a   : > { %706 = vmatpush1.bf16.msra.mxu0 %v705_v16  ;;  %732 = vmatprep.subr.bf16.mxu1 %v731_v24 }
  0x8d   : > { %380 = vmatmul.mubr.f32.vlgmr.msra.gmra.mrb[0].mxu0 %v269_v23  ;;  %734 = vmatpush3.bf16.msra.mxu1 %v733_v27 }
  0x8e   : > { %736 = vmatprep.subr.bf16.mxu1 %v735_v30 }
  0x91   : > { %738 = vmatpush3.bf16.msra.mxu1 %v737_v33 }
 0x160   : > { %v381_v41 = vpop.f32.mrb[0].mxu0 }
 0x161   : > { %v382_v42 = vadd.f32 %v381_v41, %v308_v39  ;;  %v383_v43 = vpop.f32.mrb[1].mxu0 }
 0x162   : > { %v384_v44 = vadd.f32 %v383_v43, %v312_v40 }
 0x163   : > { %v386_v46 = vmax.f32 %v382_v42, 0.0 }
 0x164   : > { %v387_v45 = vmax.f32 %v384_v44, 0.0 }
 0x166   : > { %488 = vmatprep.mubr.f32.mxu1 %v387_v45 }
 0x167   : > { %489 = vmatmul.mubr.f32.vlgmr.msra.gmra.mrb[0].mxu1 %v386_v46 }
 0x23a   : > { %v672_v48 = vpop.f32.mrb[0].mxu1 }
 0x23b   : > { %v673_v50 = vpop.f32.mrb[1].mxu1 }
 0x23c   : > { %v674_v51 = vadd.f32 %v673_v50, %v672_v48 }
 0x23e   : > { %v491_v52 = vadd.f32 %v674_v51, %v423_v49 }
 0x240   : > { %v494_v53 = vadd.f32 %v491_v52, %v269_v23 }
 0x242   : > { %495 = vadd.xlane.f32.xlu0 %v494_v53  ;;  %v499_v54 = vmul.f32 %v494_v53, %v494_v53 }
 0x246   : > { %500 = vadd.xlane.f32.xlu0 %v499_v54 }
 0x2cf   : > { %v496_v55 = vpop.xlane.xlu0 %495 }
 0x2d0   : > { %v498_v56 = vmul.f32 0.0078125, %v496_v55 }
 0x2d2   : > { %v503_v58 = vmul.f32 %v498_v56, %v498_v56  ;;  %v506_v1 = vsub.f32 %v494_v53, %v498_v56 }
 0x2d3   : > { %v501_v57 = vpop.xlane.xlu0 %500 }
 0x2d4   : > { %v502_v59 = vmul.f32 0.0078125, %v501_v57 }
 0x2d6   : > { %v504_v60 = vsub.f32 %v502_v59, %v503_v58 }
 0x2d8   : > { %v505_v61 = vmax.f32 %v504_v60, 0.0 }
 0x2da   : > { %v507_v62 = vadd.f32 1e-05, %v505_v61 }
 0x2dc   : > { %811 = vrsqrt.f32 %v507_v62 }
 0x2e6   : > { %v812_v2 = vpop.eup %811 }
 0x2e7   : > { %v509_v4 = vmul.f32 %v812_v2, %v506_v1 }
 0x2e9   : > { %v514_v5 = vmul.f32 %v513_v0, %v509_v4 }
 0x2eb   : > { %v519_v6 = vadd.f32 %v518_v3, %v514_v5 }
 0x2ed   : > { %520 = vst [vmem:[%s268_s13] sm:$0xff] %v519_v6 }
 0x2ee   : > { %912 = shalt.err (!%p909_p2)
}
 0x2ef   : > { %s913_s14 = scalar_lea.hbm %s1208_s8, 128  ;;  %s917_s26 = scalar_lea.hbm %s1257_s5, 256 }
 0x2f0   : > { %p914_p13 = scmp.ne.s32.totalorder %s1208_s8, %s913_s14  ;;  %p918_p4 = scmp.lt.u32.totalorder %s1208_s8, %s1257_s5 }
 0x2f1   : > { %p919_p7 = scmp.lt.u32.totalorder %s917_s26, %s913_s14  ;;  %p921_p11 = scmp.lt.u32.totalorder %s913_s14, %s1208_s8 }
 0x2f2   : > { %p915_p6 = pnand %p914_p13, %p1271_p0 }
 0x2f3   : > { %p920_p8 = por %p919_p7, %p918_p4 }
 0x2f4   : > { %p916_p10 = pneg %p915_p6 }
 0x2f5   : > { %p922_p1 = por %p921_p11, %p920_p8 }
 0x2f7   : > { %p923_p3 = pnand %p922_p1, %p916_p10 }
 0x2f9   : > { %926 = shalt.err (!%p923_p3)
}
 0x2fa   : > { %749 = dma.vmem_to_hbm [thread:$0]  (%p1271_p0), %s1210_s7, 128, %s1208_s8, %s522_s9  }
 0x2fb PF: > { %s547_s12 = sand.u32 1, %s957_s18   ;;  %p1272_p5 = scmp.ne.s32.totalorder %s1262_s25, 0 }
 0x2fc   : > { %p1273_p9 = scmp.ge.s32.totalorder %s969_s21, 2  ;;  %s548_s13 = scalar_lea.sflag [#allocation4], %s547_s12 }
 0x2fe   : > { %p763_p12 = pnand %p1273_p9, %p1272_p5 }
 0x300   : > { %952 = dma.done.wait (!%p763_p12), %s548_s13, 128  }
 0x301   : > { %954 = vsyncadd (!%p763_p12), %s548_s13, 4294967168  ;;  %p19_p2 = scmp.ge.s32.totalorder %s1120_s16, 4   ;;  %s1274_s18 = smov %s961_s19 }
 0x302   : > { %s1275_s19 = smov %s965_s20  ;;  %s1276_s20 = smov %s1129_s27 }
 0x303   : > { %s1277_s21 = smov %s1120_s16  ;;  %21 = sbr.rel (!%p19_p2) target bundleno = 6 (0x6), region = 93 }
 0x30a   :  { %553 = vsyncpa [#allocation3], 1 }
 0x30b   :  { %555 = vsyncpa [#allocation3 + $0x1], 1 }
 0x30c   :  { %556 = vsyncpa [#allocation6], 1 }
 0x30d   :  { %557 = vsyncpa [#allocation4], 1 }
 0x30e   :  { %559 = vsyncpa [#allocation4 + $0x1], 1 }

</bundles_post_ra>
